<compile_context>
chip_gen: v7x
topology: tpu7x:2x2x1
jax: 0.10.0
libtpu: 0.0.40
codegen_flags: <defaults>
</compile_context>

<pallas_src>
import numpy as np
import jax
import jax.numpy as jnp
from jax.experimental import pallas as pl
from jax.experimental.pallas import tpu as pltpu

LANE = 128  # TPU lane width


def _label_transform_kernel(answers_ref, vocab_ref, out_ref):
    # answers_ref: [1, B_pad] int32  -- batch of answer values (lane axis = batch)
    # vocab_ref:   [V, 1]     int32  -- sorted unique answer list, -1 padded
    # out_ref:     [1, B_pad] int32  -- index of each answer in the answer list
    a = answers_ref[...]                              # [1, B_pad]
    v = vocab_ref[...]                                # [V, 1]
    # Rank count: valid (non-padding) vocab entries strictly less than the answer.
    lt = jnp.logical_and(v < a, v >= 0)               # [V, B_pad]
    out_ref[...] = jnp.sum(lt.astype(jnp.int32), axis=0, keepdims=True)  # [1, B_pad]


def label_transform(answers: jax.Array, answer_list: jax.Array) -> jax.Array:
    """answers: [B] int32 (non-negative) values present in answer_list.
    answer_list: [V] int32, sorted unique values padded at the end with -1.
    Returns [B] int32 indices into answer_list."""
    B = answers.shape[0]
    V = answer_list.shape[0]
    b_pad = ((B + LANE - 1) // LANE) * LANE

    # Lane-major layouts for the kernel (single int32 cast, no extra churn).
    a_row = jnp.zeros((1, b_pad), jnp.int32).at[0, :B].set(answers.astype(jnp.int32))
    v_col = answer_list.astype(jnp.int32).reshape(V, 1)

    out = pl.pallas_call(
        _label_transform_kernel,
        out_shape=jax.ShapeDtypeStruct((1, b_pad), jnp.int32),
        in_specs=[
            pl.BlockSpec(memory_space=pltpu.MemorySpace.VMEM),
            pl.BlockSpec(memory_space=pltpu.MemorySpace.VMEM),
        ],
        out_specs=pl.BlockSpec(memory_space=pltpu.MemorySpace.VMEM),
    )(a_row, v_col)
    return out[0, :B]


if __name__ == "__main__":
    # Deterministic synthetic setup (no checkpoint / dataset files).
    key = jax.random.PRNGKey(0)
    B = 16        # batch_size from LabelTransform.__init__
    V_PAD = 128   # padded unique-answer-list length (lane-aligned)

    # Raw "answers" for the batch: small non-negative integer label values.
    answers_vals = jax.random.randint(key, (B,), minval=0, maxval=40, dtype=jnp.int32)

    # get_answer_list equivalent: sorted unique of the observed answers,
    # fixed-size for the kernel, padded at the end with -1 (never matches,
    # excluded from the rank count via v >= 0).
    # TODO(synk): the dict/list iteration of get_answer_list stays host-side.
    answer_list = jnp.unique(answers_vals, size=V_PAD, fill_value=-1).astype(jnp.int32)

    # Forward pass (hot path inside the Pallas kernel).
    idx = label_transform(answers_vals, answer_list)
    idx = jax.block_until_ready(idx)

    # Reference (exactly the np.where(...).squeeze() semantics of the module).
    answers_np = np.asarray(answers_vals)
    answer_list_np = np.asarray(answer_list)
    ref = np.array(
        [np.where(answer_list_np == a)[0] for a in answers_np]
    ).squeeze()

    assert idx.shape == (B,)
    assert np.array_equal(np.asarray(idx), ref.astype(np.int32)), (idx, ref)
    print("KERNEL_OK")
</pallas_src>

<mosaic_0001>
module attributes {stable_mosaic.version = 11 : i64} {
  func.func @_label_transform_kernel(%arg0: memref<1x128xi32, #tpu.memory_space<vmem>>, %arg1: memref<128x1xi32, #tpu.memory_space<vmem>>, %arg2: memref<1x128xi32, #tpu.memory_space<vmem>>) attributes {dimension_semantics = [], scalar_prefetch = 0 : i64, scratch_operands = 0 : i64, tpu.core_type = #tpu.core_type<tc>} {
    %c0 = arith.constant 0 : index
    %c0_0 = arith.constant 0 : index
    %0 = vector.load %arg0[%c0, %c0_0] : memref<1x128xi32, #tpu.memory_space<vmem>>, vector<1x128xi32>
    %c0_1 = arith.constant 0 : index
    %c0_2 = arith.constant 0 : index
    %1 = vector.load %arg1[%c0_1, %c0_2] : memref<128x1xi32, #tpu.memory_space<vmem>>, vector<128x1xi32>
    %2 = vector.broadcast %1 : vector<128x1xi32> to vector<128x128xi32>
    %3 = vector.broadcast %0 : vector<1x128xi32> to vector<128x128xi32>
    %4 = arith.cmpi slt, %2, %3 : vector<128x128xi32>
    %c0_i32 = arith.constant 0 : i32
    %5 = vector.broadcast %c0_i32 : i32 to vector<128x1xi32>
    %6 = arith.cmpi sge, %1, %5 : vector<128x1xi32>
    %7 = vector.broadcast %6 : vector<128x1xi1> to vector<128x128xi1>
    %8 = arith.andi %4, %7 : vector<128x128xi1>
    %9 = arith.extui %8 : vector<128x128xi1> to vector<128x128xi32>
    %cst = arith.constant dense<0> : vector<128xi32>
    %10 = vector.multi_reduction <add>, %9, %cst [0] : vector<128x128xi32> to vector<128xi32>
    %11 = vector.shape_cast %10 : vector<128xi32> to vector<1x128xi32>
    %c0_3 = arith.constant 0 : index
    %c0_4 = arith.constant 0 : index
    %12 = vector.load %arg2[%c0_3, %c0_4] : memref<1x128xi32, #tpu.memory_space<vmem>>, vector<1x128xi32>
    tpu.vector_store %arg2[%c0_3, %c0_4], %11 {strides = array<i32>} : memref<1x128xi32, #tpu.memory_space<vmem>>, vector<1x128xi32>,
    return
  }
}

</mosaic_0001>

<bundles_post_ra>
// kernel: tpu_custom_call.1
= control target key start
LH: loop header
LB: loop body
LE: loop exit
PB: predicated region body
PF: predicated region fallthrough
CT: control target
= control target key end

     0   :  { %v290_v2 = vmov 0   ;;  %s470_s0 = inlined_call_operand.vmem [shape: s32[1,128], index: 0, kind: input, shape index: {}]   ;;  %s471_s1 = inlined_call_operand.vmem [shape: s32[128,1], index: 1, kind: input, shape index: {}]   ;;  %s472_s2 = inlined_call_operand.hbm [shape: s32[1,128], index: 2, kind: output, shape index: {}]  }
   0x1   :  { %v15_v0 = vld [vmem:[%s471_s1 + $0x10] sm:$0xff]  ;;  %v13_v1 = vld [vmem:[%s471_s1] sm:$0xff]  ;;  %265 = vset.pattern.permute.xlu1 %v290_v2  ;;  %264 = vset.pattern.permute.xlu0 %v290_v2  ;;  %v16_v3 = vld [vmem:[%s471_s1 + $0x18] sm:$0xff] }
   0x2   :  { %36 = vperm.xlu1 %265, %v15_v0   ;;  %30 = vperm.xlu0 %264, %v13_v1   ;;  %v14_v4 = vld [vmem:[%s471_s1 + $0x8] sm:$0xff]  ;;  %v17_v6 = vld [vmem:[%s471_s1 + $0x20] sm:$0xff] }
   0x3   :  { %v18_v5 = vld [vmem:[%s471_s1 + $0x28] sm:$0xff] }
   0x6   :  { %39 = vperm.xlu1 %265, %v16_v3   ;;  %33 = vperm.xlu0 %264, %v14_v4  }
   0x7   :  { %7 = vsyncpa [#allocation3], 0  ;;  %v20_v7 = vld [vmem:[%s471_s1 + $0x38] sm:$0xff]  ;;  %v19_v8 = vld [vmem:[%s471_s1 + $0x30] sm:$0xff]  ;;  %vm97_vm0 = vcmp.ge.s32.totalorder %v13_v1, 0  ;;  %vm98_vm1 = vcmp.ge.s32.totalorder %v14_v4, 0 }
   0x8   :  { %v22_v9 = vld [vmem:[%s471_s1 + $0x48] sm:$0xff]  ;;  %v21_v10 = vld [vmem:[%s471_s1 + $0x40] sm:$0xff]  ;;  %v114_v11 = vsel %vm98_vm1, 1, %v290_v2  ;;  %v113_v12 = vsel %vm97_vm0, 1, %v290_v2  ;;  %vm99_vm2 = vcmp.ge.s32.totalorder %v15_v0, 0  ;;  %vm100_vm3 = vcmp.ge.s32.totalorder %v16_v3, 0 }
   0x9   :  { %v116_v13 = vsel %vm100_vm3, 1, %v290_v2  ;;  %v115_v14 = vsel %vm99_vm2, 1, %v290_v2  ;;  %vm102_vm4 = vcmp.ge.s32.totalorder %v18_v5, 0  ;;  %vm101_vm5 = vcmp.ge.s32.totalorder %v17_v6, 0  ;;  %v24_v19 = vld [vmem:[%s471_s1 + $0x58] sm:$0xff]  ;;  %v23_v20 = vld [vmem:[%s471_s1 + $0x50] sm:$0xff] }
   0xa   :  { %45 = vperm.xlu1 %265, %v18_v5   ;;  %42 = vperm.xlu0 %264, %v17_v6   ;;  %v118_v15 = vsel %vm102_vm4, 1, %v290_v2  ;;  %v117_v16 = vsel %vm101_vm5, 1, %v290_v2  ;;  %vm104_vm6 = vcmp.ge.s32.totalorder %v20_v7, 0  ;;  %vm103_vm7 = vcmp.ge.s32.totalorder %v19_v8, 0  ;;  %v26_v25 = vld [vmem:[%s471_s1 + $0x68] sm:$0xff]  ;;  %v25_v26 = vld [vmem:[%s471_s1 + $0x60] sm:$0xff] }
   0xb   :  { %v120_v17 = vsel %vm104_vm6, 1, %v290_v2  ;;  %v119_v18 = vsel %vm103_vm7, 1, %v290_v2  ;;  %vm106_vm8 = vcmp.ge.s32.totalorder %v22_v9, 0  ;;  %vm105_vm9 = vcmp.ge.s32.totalorder %v21_v10, 0  ;;  %v28_v27 = vld [vmem:[%s471_s1 + $0x78] sm:$0xff]  ;;  %v27_v28 = vld [vmem:[%s471_s1 + $0x70] sm:$0xff] }
   0xc   :  { %v122_v21 = vsel %vm106_vm8, 1, %v290_v2  ;;  %v121_v22 = vsel %vm105_vm9, 1, %v290_v2  ;;  %vm108_vm10 = vcmp.ge.s32.totalorder %v24_v19, 0  ;;  %vm107_vm11 = vcmp.ge.s32.totalorder %v23_v20, 0  ;;  %v376_v55 = vld [vmem:[%s470_s0] ss:$0 sm:$0xff] }
   0xd   :  { %v124_v23 = vsel %vm108_vm10, 1, %v290_v2  ;;  %v123_v24 = vsel %vm107_vm11, 1, %v290_v2  ;;  %vm110_vm12 = vcmp.ge.s32.totalorder %v26_v25, 0  ;;  %vm109_vm13 = vcmp.ge.s32.totalorder %v25_v26, 0  ;;  %s291_s0 = smov [#allocation2]  }
   0xe   :  { %51 = vperm.xlu1 %265, %v20_v7   ;;  %48 = vperm.xlu0 %264, %v19_v8   ;;  %v126_v29 = vsel %vm110_vm12, 1, %v290_v2  ;;  %v125_v30 = vsel %vm109_vm13, 1, %v290_v2  ;;  %vm112_vm14 = vcmp.ge.s32.totalorder %v28_v27, 0  ;;  %vm111_vm15 = vcmp.ge.s32.totalorder %v27_v28, 0  ;;  %s253_s14 = sshll.u32 %s291_s0, 4  ;;  %s254_s14 = int_to_ptr.vmem [resolvable:$true] %s253_s14 }
   0xf   :  { %v128_v31 = vsel %vm112_vm14, 1, %v290_v2  ;;  %v127_v32 = vsel %vm111_vm15, 1, %v290_v2  ;;  %v477_v60 = vmov 0  ;;  %v479_v63 = vmov 0  ;;  %s266_s15 = scalar_lea.vmem %s254_s14, 16  ;;  %s270_s16 = scalar_lea.vmem %s254_s14, 32 }
  0x10   :  { %v481_v0 = vmov 0  ;;  %p267_p0 = scmp.ne.s32.totalorder %s254_s14, %s266_s15  ;;  %p271_p1 = scmp.lt.s32.totalorder %s254_s14, %s254_s14 }
  0x11   :  { %p272_p2 = scmp.lt.s32.totalorder %s270_s16, %s266_s15 }
  0x12   :  { %57 = vperm.xlu1 %265, %v22_v9   ;;  %54 = vperm.xlu0 %264, %v21_v10  }
  0x13   :  { %p273_p3 = por %p272_p2, %p271_p1 }
  0x15   :  { %p274_p4 = pnand %p273_p3, %p267_p0 }
  0x16   :  { %133 = vperm.xlu1 %265, %v114_v11   ;;  %130 = vperm.xlu0 %264, %v113_v12  }
  0x1a   :  { %139 = vperm.xlu1 %265, %v116_v13   ;;  %136 = vperm.xlu0 %264, %v115_v14  }
  0x1e   :  { %145 = vperm.xlu1 %265, %v118_v15   ;;  %142 = vperm.xlu0 %264, %v117_v16  }
  0x22   :  { %151 = vperm.xlu1 %265, %v120_v17   ;;  %148 = vperm.xlu0 %264, %v119_v18  }
  0x26   :  { %63 = vperm.xlu1 %265, %v24_v19   ;;  %60 = vperm.xlu0 %264, %v23_v20  }
  0x2a   :  { %157 = vperm.xlu1 %265, %v122_v21   ;;  %154 = vperm.xlu0 %264, %v121_v22  }
  0x2e   :  { %163 = vperm.xlu1 %265, %v124_v23   ;;  %160 = vperm.xlu0 %264, %v123_v24  }
  0x32   :  { %69 = vperm.xlu1 %265, %v26_v25   ;;  %66 = vperm.xlu0 %264, %v25_v26  }
  0x36   :  { %75 = vperm.xlu1 %265, %v28_v27   ;;  %72 = vperm.xlu0 %264, %v27_v28  }
  0x3a   :  { %169 = vperm.xlu1 %265, %v126_v29   ;;  %166 = vperm.xlu0 %264, %v125_v30  }
  0x3e   :  { %175 = vperm.xlu1 %265, %v128_v31   ;;  %172 = vperm.xlu0 %264, %v127_v32  }
  0x81   :  { %v37_v33 = vpop.permute.xlu1 %36  ;;  %v31_v34 = vpop.permute.xlu0 %30 }
  0x82   :  { %vm81_vm4 = vcmp.lt.s32.totalorder %v31_v34, %v376_v55  ;;  %vm83_vm10 = vcmp.lt.s32.totalorder %v37_v33, %v376_v55 }
  0x85   :  { %v40_v35 = vpop.permute.xlu1 %39  ;;  %v34_v36 = vpop.permute.xlu0 %33 }
  0x86   :  { %vm82_vm2 = vcmp.lt.s32.totalorder %v34_v36, %v376_v55  ;;  %vm84_vm7 = vcmp.lt.s32.totalorder %v40_v35, %v376_v55 }
  0x89   :  { %v46_v37 = vpop.permute.xlu1 %45  ;;  %v43_v38 = vpop.permute.xlu0 %42 }
  0x8a   :  { %vm86_vm13 = vcmp.lt.s32.totalorder %v46_v37, %v376_v55 }
  0x8d   :  { %v52_v39 = vpop.permute.xlu1 %51  ;;  %v49_v40 = vpop.permute.xlu0 %48 }
  0x91   :  { %v58_v41 = vpop.permute.xlu1 %57  ;;  %v55_v42 = vpop.permute.xlu0 %54 }
  0x95   :  { %v134_v43 = vpop.permute.xlu1 %133  ;;  %v131_v44 = vpop.permute.xlu0 %130 }
  0x96   :  { %vm178_vm0 = vcmp.eq.s32.totalorder %v134_v43, 1  ;;  %vm177_vm1 = vcmp.eq.s32.totalorder %v131_v44, 1 }
  0x97   :  { %vm380_vm5 = vmand %vm82_vm2, %vm178_vm0  ;;  %vm85_vm0 = vcmp.lt.s32.totalorder %v43_v38, %v376_v55 }
  0x98   :  { %vm385_vm8 = vmand %vm81_vm4, %vm177_vm1  ;;  %v210_v6 = vsel %vm380_vm5, 1, %v290_v2 }
  0x99   :  { %v140_v45 = vpop.permute.xlu1 %139  ;;  %v137_v46 = vpop.permute.xlu0 %136  ;;  %v209_v7 = vsel %vm385_vm8, 1, %v290_v2 }
  0x9a   :  { %vm180_vm3 = vcmp.eq.s32.totalorder %v140_v45, 1  ;;  %vm179_vm6 = vcmp.eq.s32.totalorder %v137_v46, 1 }
  0x9b   :  { %vm390_vm11 = vmand %vm84_vm7, %vm180_vm3  ;;  %vm88_vm3 = vcmp.lt.s32.totalorder %v52_v39, %v376_v55 }
  0x9c   :  { %v478_v60 = vsel %vm390_vm11, 4294967295, %v477_v60  ;;  %vm395_vm14 = vmand %vm83_vm10, %vm179_vm6  ;;  %vm87_vm6 = vcmp.lt.s32.totalorder %v49_v40, %v376_v55  ;;  %vm89_vm11 = vcmp.lt.s32.totalorder %v55_v42, %v376_v55 }
  0x9d   :  { %v146_v47 = vpop.permute.xlu1 %145  ;;  %v143_v48 = vpop.permute.xlu0 %142  ;;  %v480_v63 = vsel %vm395_vm14, 4294967295, %v479_v63 }
  0x9e   :  { %vm182_vm9 = vcmp.eq.s32.totalorder %v146_v47, 1  ;;  %vm181_vm12 = vcmp.eq.s32.totalorder %v143_v48, 1 }
  0x9f   :  { %vm400_vm1 = vmand %vm86_vm13, %vm182_vm9  ;;  %vm90_vm9 = vcmp.lt.s32.totalorder %v58_v41, %v376_v55 }
  0xa0   :  { %v482_v0 = vsel %vm400_vm1, 4294967295, %v481_v0  ;;  %vm405_vm4 = vmand %vm85_vm0, %vm181_vm12 }
  0xa1   :  { %v152_v49 = vpop.permute.xlu1 %151  ;;  %v149_v50 = vpop.permute.xlu0 %148  ;;  %v213_v10 = vsel %vm405_vm4, 1, %v290_v2 }
  0xa2   :  { %vm184_vm15 = vcmp.eq.s32.totalorder %v152_v49, 1  ;;  %vm183_vm2 = vcmp.eq.s32.totalorder %v149_v50, 1  ;;  %v225_v20 = vadd.s32 %v213_v10, %v209_v7 }
  0xa3   :  { %vm410_vm10 = vmand %vm88_vm3, %vm184_vm15  ;;  %vm487_vm15 = vnez %v478_v60 }
  0xa4   :  { %vm199_vm13 = vmand %vm87_vm6, %vm183_vm2  ;;  %v212_v8 = vsel %vm487_vm15, 1, %v290_v2  ;;  %vm488_vm2 = vnez %v482_v0  ;;  %v216_v11 = vsel %vm410_vm10, 1, %v290_v2  ;;  %vm491_vm10 = vnez %v480_v63 }
  0xa5   :  { %v64_v51 = vpop.permute.xlu1 %63  ;;  %v61_v52 = vpop.permute.xlu0 %60  ;;  %v214_v9 = vsel %vm488_vm2, 1, %v290_v2  ;;  %v215_v12 = vsel %vm199_vm13, 1, %v290_v2  ;;  %v211_v17 = vsel %vm491_vm10, 1, %v290_v2  ;;  %v228_v21 = vadd.s32 %v216_v11, %v212_v8 }
  0xa6   :  { %vm92_vm3 = vcmp.lt.s32.totalorder %v64_v51, %v376_v55  ;;  %vm91_vm5 = vcmp.lt.s32.totalorder %v61_v52, %v376_v55  ;;  %v226_v18 = vadd.s32 %v214_v9, %v210_v6  ;;  %v227_v22 = vadd.s32 %v215_v12, %v211_v17 }
  0xa9   :  { %v158_v53 = vpop.permute.xlu1 %157  ;;  %v155_v54 = vpop.permute.xlu0 %154 }
  0xaa   :  { %vm186_vm7 = vcmp.eq.s32.totalorder %v158_v53, 1  ;;  %vm185_vm14 = vcmp.eq.s32.totalorder %v155_v54, 1 }
  0xab   :  { %vm202_vm12 = vmand %vm90_vm9, %vm186_vm7 }
  0xac   :  { %vm201_vm6 = vmand %vm89_vm11, %vm185_vm14  ;;  %v218_v16 = vsel %vm202_vm12, 1, %v290_v2 }
  0xad   :  { %v164_v56 = vpop.permute.xlu1 %163  ;;  %v161_v57 = vpop.permute.xlu0 %160  ;;  %v217_v19 = vsel %vm201_vm6, 1, %v290_v2  ;;  %v230_v24 = vadd.s32 %v226_v18, %v218_v16 }
  0xae   :  { %vm188_vm1 = vcmp.eq.s32.totalorder %v164_v56, 1  ;;  %vm187_vm0 = vcmp.eq.s32.totalorder %v161_v57, 1  ;;  %v229_v30 = vadd.s32 %v225_v20, %v217_v19 }
  0xaf   :  { %vm437_vm8 = vmand %vm92_vm3, %vm188_vm1 }
  0xb0   :  { %vm203_vm11 = vmand %vm91_vm5, %vm187_vm0  ;;  %v220_v23 = vsel %vm437_vm8, 1, %v290_v2 }
  0xb1   :  { %v70_v61 = vpop.permute.xlu1 %69  ;;  %v67_v62 = vpop.permute.xlu0 %66  ;;  %v219_v25 = vsel %vm203_vm11, 1, %v290_v2  ;;  %v232_v31 = vadd.s32 %v228_v21, %v220_v23 }
  0xb2   :  { %vm94_vm14 = vcmp.lt.s32.totalorder %v70_v61, %v376_v55  ;;  %vm93_vm1 = vcmp.lt.s32.totalorder %v67_v62, %v376_v55  ;;  %v231_v32 = vadd.s32 %v227_v22, %v219_v25 }
  0xb5   :  { %v76_v4 = vpop.permute.xlu1 %75  ;;  %v73_v5 = vpop.permute.xlu0 %72 }
  0xb6   :  { %vm96_vm12 = vcmp.lt.s32.totalorder %v76_v4, %v376_v55  ;;  %vm95_vm2 = vcmp.lt.s32.totalorder %v73_v5, %v376_v55 }
  0xb9   :  { %v170_v14 = vpop.permute.xlu1 %169  ;;  %v167_v15 = vpop.permute.xlu0 %166 }
  0xba   :  { %vm190_vm4 = vcmp.eq.s32.totalorder %v170_v14, 1  ;;  %vm189_vm7 = vcmp.eq.s32.totalorder %v167_v15, 1 }
  0xbb   :  { %vm206_vm9 = vmand %vm94_vm14, %vm190_vm4 }
  0xbc   :  { %vm205_vm13 = vmand %vm93_vm1, %vm189_vm7  ;;  %v222_v26 = vsel %vm206_vm9, 1, %v290_v2 }
  0xbd   :  { %v221_v27 = vsel %vm205_vm13, 1, %v290_v2  ;;  %v176_v28 = vpop.permute.xlu1 %175  ;;  %v173_v29 = vpop.permute.xlu0 %172  ;;  %v234_v33 = vadd.s32 %v230_v24, %v222_v26 }
  0xbe   :  { %vm192_vm0 = vcmp.eq.s32.totalorder %v176_v28, 1  ;;  %vm191_vm15 = vcmp.eq.s32.totalorder %v173_v29, 1  ;;  %v233_v34 = vadd.s32 %v229_v30, %v221_v27 }
  0xbf   :  { %vm208_vm3 = vmand %vm96_vm12, %vm192_vm0 }
  0xc0   :  { %v224_v35 = vsel %vm208_vm3, 1, %v290_v2  ;;  %vm207_vm6 = vmand %vm95_vm2, %vm191_vm15  ;;  %v237_v39 = vadd.s32 %v234_v33, %v233_v34 }
  0xc1   :  { %v236_v36 = vadd.s32 %v232_v31, %v224_v35  ;;  %v223_v37 = vsel %vm207_vm6, 1, %v290_v2 }
  0xc2   :  { %v235_v38 = vadd.s32 %v231_v32, %v223_v37 }
  0xc4   :  { %v238_v40 = vadd.s32 %v236_v36, %v235_v38 }
  0xc6   :  { %v239_v41 = vadd.s32 %v238_v40, %v237_v39 }
  0xc8   :  { %v240_v42 = vrot.slane %v239_v41, 4 }
  0xca   :  { %v241_v43 = vadd.s32 %v240_v42, %v239_v41 }
  0xcc   :  { %v242_v44 = vrot.slane %v241_v43, 2 }
  0xce   :  { %v243_v45 = vadd.s32 %v242_v44, %v241_v43 }
  0xd0   :  { %v244_v46 = vrot.slane %v243_v45, 1 }
  0xd2   :  { %v245_v47 = vadd.s32 %v244_v46, %v243_v45 }
  0xd4   :  { %246 = vst [vmem:[#allocation2] sm:$0x1] %v245_v47 }
  0xd5   :  { %277 = shalt.err (!%p274_p4)
}
  0xd6   :  { %s278_s19 = scalar_lea.hbm %s472_s2, 16 }
  0xd7   :  { %p279_p5 = scmp.ne.s32.totalorder %s472_s2, %s278_s19  ;;  %p282_p6 = scmp.lt.u32.totalorder %s278_s19, %s472_s2 }
  0xd9   :  { %p284_p7 = pnand %p282_p6, %p279_p5 }
  0xdb   :  { %287 = shalt.err (!%p284_p7)
}
  0xdc   :  { %256 = dma.vmem_to_hbm [thread:$0]  %s254_s14, 16, %s472_s2, [#allocation3]  }
  0xdd   :  { %288 = dma.done.wait [#allocation3], 16  }
  0xde   :  { %289 = vsyncadd [#allocation3], 4294967280 }
  0xdf   :  { %260 = vsyncpa [#allocation3], 1 }

</bundles_post_ra>
